<compile_context>
chip_gen: v7x
topology: tpu7x:2x2x1
jax: 0.10.0
libtpu: 0.0.40
codegen_flags: <defaults>
</compile_context>

<pallas_src>
import jax
import jax.numpy as jnp
from jax import lax
from jax.experimental import pallas as pl
from jax.experimental.pallas import tpu as pltpu

EPS = 1e-12                              # F.normalize default eps
_LANE = 128
_MAX_TILE_P = 2048                       # lanes per grid step (512-2048 ~ HBM roofline)
_VMEM_TILE_BUDGET = 12 * 1024 * 1024     # double-buffered activation bytes per call

# Both grid axes (batch, lane-tile) are independent -> "parallel" (feeds both
# TensorCores on v7x; harmless on v5e/v6e).  vmem_limit raised so v5e's 16 MiB
# scoped default does not bite; 32 MiB is within physical VMEM on every gen.
_COMPILER_PARAMS = pltpu.CompilerParams(
    dimension_semantics=("parallel", "parallel"),
    vmem_limit_bytes=32 * 1024 * 1024,
)


# ----------------------- helpers -----------------------

def _round_up(n, m):
    return (n + m - 1) // m * m


def _pick_tile(p, rows_per_lane):
    """Lane tile (multiple of 128) + padded lane extent, sized to the VMEM budget.

    rows_per_lane: total f32 rows (inputs + outputs) carried per lane per step.
    """
    p128 = _round_up(p, _LANE)
    max_by_vmem = _VMEM_TILE_BUDGET // (2 * rows_per_lane * 4)  # 2x double-buffer, 4B/f32
    max_by_vmem = max(_LANE, (max_by_vmem // _LANE) * _LANE)
    tile = min(p128, _MAX_TILE_P, max_by_vmem)
    return tile, _round_up(p128, tile)


def _pad_lanes(xf, p_pad):
    p = xf.shape[-1]
    if p_pad == p:
        return xf
    return jnp.pad(xf, ((0, 0), (0, 0), (0, p_pad - p)))


# ----------------------- Pallas kernels -----------------------

def _l2norm_kernel(x_ref, o_ref):
    # x_ref: (1, C, TILE_P); L2-normalize over channel axis (torch F.normalize, dim=1).
    x = x_ref[...]
    ss = jnp.sum(x * x, axis=1, keepdims=True)            # (1, 1, TILE_P)
    # inv = 1 / max(||x||, eps)  ==  min(rsqrt(ss), 1/eps); rsqrt runs on the EUP slot.
    inv = jnp.minimum(lax.rsqrt(ss), 1.0 / EPS)
    o_ref[...] = x * inv


def _cmix_kernel(x_ref, w_ref, o_ref):
    # Block-packed complex channel mix: one real matmul on the MXU.
    # x_ref: (1, 2*Cin, TILE_P), w_ref: (2*Cout, 2*Cin), o_ref: (1, 2*Cout, TILE_P).
    o_ref[0] = jnp.dot(w_ref[...], x_ref[0], preferred_element_type=jnp.float32)


def _silu_kernel(x_ref, o_ref):
    x = x_ref[...]
    o_ref[...] = x * jax.nn.sigmoid(x)   # sigmoid -> EUP; VPU keeps just one mul


# ----------------------- wrappers -----------------------

def l2_normalize_channels(x):
    # x: (B, C, H, W) -> F.normalize(x, p=2, dim=1)
    B, C, H, W = x.shape
    P = H * W
    tile, p_pad = _pick_tile(P, rows_per_lane=2 * C)        # C in + C out
    xf = _pad_lanes(x.reshape(B, C, P), p_pad)
    out = pl.pallas_call(
        _l2norm_kernel,
        out_shape=jax.ShapeDtypeStruct((B, C, p_pad), x.dtype),
        grid=(B, p_pad // tile),
        in_specs=[pl.BlockSpec((1, C, tile), lambda b, p: (b, 0, p))],
        out_specs=pl.BlockSpec((1, C, tile), lambda b, p: (b, 0, p)),
        compiler_params=_COMPILER_PARAMS,
    )(xf)
    return out[:, :, :P].reshape(B, C, H, W)


def complex_channel_mix(xft, w):
    # xft: (B, Cin, Hf, Wf) complex64 ; w: (Cin, Cout) complex64
    # returns einsum('bixy,io->boxy', xft, w)
    B, Cin, Hf, Wf = xft.shape
    Cout = w.shape[1]
    P = Hf * Wf
    tile, p_pad = _pick_tile(P, rows_per_lane=2 * Cin + 2 * Cout)

    # Stacked [Re; Im] activations in one pass: (B, 2*Cin, p_pad) f32.
    x2 = jnp.concatenate([jnp.real(xft), jnp.imag(xft)], axis=1)
    x2 = _pad_lanes(x2.reshape(B, 2 * Cin, P).astype(jnp.float32), p_pad)

    # Block-packed weight (2*Cout, 2*Cin): [[wr, -wi], [wi, wr]] with w pre-transposed.
    wtr = jnp.real(w).T.astype(jnp.float32)                 # (Cout, Cin)
    wti = jnp.imag(w).T.astype(jnp.float32)
    w_blk = jnp.concatenate(
        [jnp.concatenate([wtr, -wti], axis=1),
         jnp.concatenate([wti, wtr], axis=1)], axis=0)

    y2 = pl.pallas_call(
        _cmix_kernel,
        out_shape=jax.ShapeDtypeStruct((B, 2 * Cout, p_pad), jnp.float32),
        grid=(B, p_pad // tile),
        in_specs=[pl.BlockSpec((1, 2 * Cin, tile), lambda b, p: (b, 0, p)),
                  pl.BlockSpec((2 * Cout, 2 * Cin), lambda b, p: (0, 0))],
        out_specs=pl.BlockSpec((1, 2 * Cout, tile), lambda b, p: (b, 0, p)),
        compiler_params=_COMPILER_PARAMS,
    )(x2, w_blk)

    y2 = y2[:, :, :P].reshape(B, 2 * Cout, Hf, Wf)
    return lax.complex(y2[:, :Cout], y2[:, Cout:])


def silu(x):
    B, C, H, W = x.shape
    P = H * W
    tile, p_pad = _pick_tile(P, rows_per_lane=2 * C)
    xf = _pad_lanes(x.reshape(B, C, P), p_pad)
    out = pl.pallas_call(
        _silu_kernel,
        out_shape=jax.ShapeDtypeStruct((B, C, p_pad), x.dtype),
        grid=(B, p_pad // tile),
        in_specs=[pl.BlockSpec((1, C, tile), lambda b, p: (b, 0, p))],
        out_specs=pl.BlockSpec((1, C, tile), lambda b, p: (b, 0, p)),
        compiler_params=_COMPILER_PARAMS,
    )(xf)
    return out[:, :, :P].reshape(B, C, H, W)


def feed_forward(x, w_complex):
    """Pallas implementation of feedForward.forward.

    x: (B, in_channels, H, W) float32 ; w_complex: (in_channels, out_channels) complex64.
    (self.rms_norm is defined in __init__ but unused in forward -> omitted.)
    """
    xn = l2_normalize_channels(x)
    # TODO(synk): rfft2/irfft2 have no clean Pallas equivalent; kept in plain JAX.
    xft = jnp.fft.rfft2(xn, norm='ortho')
    yft = complex_channel_mix(xft, w_complex)
    y = jnp.fft.irfft2(yft, norm='ortho').astype(jnp.float32)
    return silu(y)


# ----------------------- reference (pure JAX) -----------------------

def feed_forward_ref(x, w):
    denom = jnp.maximum(jnp.sqrt(jnp.sum(x * x, axis=1, keepdims=True)), EPS)
    xn = x / denom
    xft = jnp.fft.rfft2(xn, norm='ortho')
    yft = jnp.einsum('bixy,io->boxy', xft, w)
    y = jnp.fft.irfft2(yft, norm='ortho').astype(jnp.float32)
    return y * jax.nn.sigmoid(y)


if __name__ == "__main__":
    key = jax.random.PRNGKey(0)
    k1, k2, k3 = jax.random.split(key, 3)

    B, Cin, Cout, H, W = 2, 4, 4, 16, 16
    x = jax.random.normal(k1, (B, Cin, H, W), dtype=jnp.float32)
    # torch.rand(..., dtype=cfloat): uniform [0,1) real and imag parts.
    w_real = jax.random.uniform(k2, (Cin, Cout), dtype=jnp.float32)
    w_imag = jax.random.uniform(k3, (Cin, Cout), dtype=jnp.float32)
    w = lax.complex(w_real, w_imag)

    out = jax.jit(feed_forward)(x, w)
    jax.block_until_ready(out)

    ref = feed_forward_ref(x, w)
    assert out.shape == (B, Cout, H, W), out.shape
    max_err = float(jnp.max(jnp.abs(out - ref)))
    assert jnp.allclose(out, ref, rtol=1e-4, atol=1e-4), max_err

    print("KERNEL_OK")
</pallas_src>

<mosaic_0001>
module attributes {stable_mosaic.version = 11 : i64} {
  func.func @_l2norm_kernel(%arg0: i32, %arg1: i32, %arg2: memref<1x4x256xf32, #tpu.memory_space<vmem>>, %arg3: memref<1x4x256xf32, #tpu.memory_space<vmem>>) attributes {dimension_semantics = [#tpu.dimension_semantics<parallel>, #tpu.dimension_semantics<parallel>], iteration_bounds = array<i64: 2, 1>, scalar_prefetch = 0 : i64, scratch_operands = 0 : i64, tpu.core_type = #tpu.core_type<tc>, window_params = [{transform_indices = @transform_0, window_bounds = array<i64: 1, 4, 256>}, {transform_indices = @transform_1, window_bounds = array<i64: 1, 4, 256>}]} {
    %c0 = arith.constant 0 : index
    %c0_0 = arith.constant 0 : index
    %c0_1 = arith.constant 0 : index
    %0 = vector.load %arg2[%c0, %c0_0, %c0_1] : memref<1x4x256xf32, #tpu.memory_space<vmem>>, vector<1x4x256xf32>
    %1 = arith.mulf %0, %0 : vector<1x4x256xf32>
    %cst = arith.constant dense<0.000000e+00> : vector<1x256xf32>
    %2 = vector.multi_reduction <add>, %1, %cst [1] : vector<1x4x256xf32> to vector<1x256xf32>
    %3 = vector.shape_cast %2 : vector<1x256xf32> to vector<1x1x256xf32>
    %4 = math.rsqrt %3 : vector<1x1x256xf32>
    %cst_2 = arith.constant 9.99999995E+11 : f32
    %5 = vector.broadcast %cst_2 : f32 to vector<1x1x256xf32>
    %6 = arith.minimumf %4, %5 : vector<1x1x256xf32>
    %7 = vector.broadcast %6 : vector<1x1x256xf32> to vector<1x4x256xf32>
    %8 = arith.mulf %0, %7 : vector<1x4x256xf32>
    %c0_3 = arith.constant 0 : index
    %c0_4 = arith.constant 0 : index
    %c0_5 = arith.constant 0 : index
    %9 = vector.load %arg3[%c0_3, %c0_4, %c0_5] : memref<1x4x256xf32, #tpu.memory_space<vmem>>, vector<1x4x256xf32>
    tpu.vector_store %arg3[%c0_3, %c0_4, %c0_5], %8 {strides = array<i32>} : memref<1x4x256xf32, #tpu.memory_space<vmem>>, vector<1x4x256xf32>,
    return
  }
  func.func @transform_0(%arg0: i32, %arg1: i32) -> (i32, i32, i32) {
    %c0_i32 = arith.constant 0 : i32
    %c0_i32_0 = arith.constant 0 : i32
    return %arg0, %c0_i32, %arg1 : i32, i32, i32
  }
  func.func @transform_1(%arg0: i32, %arg1: i32) -> (i32, i32, i32) {
    %c0_i32 = arith.constant 0 : i32
    %c0_i32_0 = arith.constant 0 : i32
    return %arg0, %c0_i32, %arg1 : i32, i32, i32
  }
}

module attributes {stable_mosaic.version = 11 : i64} {
  func.func @_cmix_kernel(%arg0: i32, %arg1: i32, %arg2: memref<1x8x256xf32, #tpu.memory_space<vmem>>, %arg3: memref<8x8xf32, #tpu.memory_space<vmem>>, %arg4: memref<1x8x256xf32, #tpu.memory_space<vmem>>) attributes {dimension_semantics = [#tpu.dimension_semantics<parallel>, #tpu.dimension_semantics<parallel>], iteration_bounds = array<i64: 2, 1>, scalar_prefetch = 0 : i64, scratch_operands = 0 : i64, tpu.core_type = #tpu.core_type<tc>, window_params = [{transform_indices = @transform_0, window_bounds = array<i64: 1, 8, 256>}, {pipeline_mode = #tpu.pipeline_mode<synchronous>, transform_indices = @transform_1, window_bounds = array<i64: 8, 8>}, {transform_indices = @transform_2, window_bounds = array<i64: 1, 8, 256>}]} {
    %c0 = arith.constant 0 : index
    %c0_0 = arith.constant 0 : index
    %0 = vector.load %arg3[%c0, %c0_0] : memref<8x8xf32, #tpu.memory_space<vmem>>, vector<8x8xf32>
    %c0_1 = arith.constant 0 : index
    %c0_2 = arith.constant 0 : index
    %c0_3 = arith.constant 0 : index
    %1 = vector.load %arg2[%c0_1, %c0_2, %c0_3] : memref<1x8x256xf32, #tpu.memory_space<vmem>>, vector<1x8x256xf32>
    %2 = vector.shape_cast %1 : vector<1x8x256xf32> to vector<8x256xf32>
    %cst = arith.constant dense<0.000000e+00> : vector<8x256xf32>
    %3 = tpu.matmul %0, %2, %cst {dimension_numbers = #tpu.dot_dimension_numbers<[1], [0], [0], [1], [0, 0, 1, 1], [], []>} : vector<8x8xf32>, vector<8x256xf32>, vector<8x256xf32> -> vector<8x256xf32>
    %c0_4 = arith.constant 0 : index
    %c0_5 = arith.constant 0 : index
    %c0_6 = arith.constant 0 : index
    %4 = vector.load %arg4[%c0_4, %c0_5, %c0_6] : memref<1x8x256xf32, #tpu.memory_space<vmem>>, vector<1x8x256xf32>
    %5 = vector.shape_cast %4 : vector<1x8x256xf32> to vector<8x256xf32>
    %6 = vector.shape_cast %3 : vector<8x256xf32> to vector<1x8x256xf32>
    tpu.vector_store %arg4[%c0_4, %c0_5, %c0_6], %6 {strides = array<i32>} : memref<1x8x256xf32, #tpu.memory_space<vmem>>, vector<1x8x256xf32>,
    return
  }
  func.func @transform_0(%arg0: i32, %arg1: i32) -> (i32, i32, i32) {
    %c0_i32 = arith.constant 0 : i32
    %c0_i32_0 = arith.constant 0 : i32
    return %arg0, %c0_i32, %arg1 : i32, i32, i32
  }
  func.func @transform_1(%arg0: i32, %arg1: i32) -> (i32, i32) {
    %c0_i32 = arith.constant 0 : i32
    %c0_i32_0 = arith.constant 0 : i32
    %c0_i32_1 = arith.constant 0 : i32
    return %c0_i32, %c0_i32_0 : i32, i32
  }
  func.func @transform_2(%arg0: i32, %arg1: i32) -> (i32, i32, i32) {
    %c0_i32 = arith.constant 0 : i32
    %c0_i32_0 = arith.constant 0 : i32
    return %arg0, %c0_i32, %arg1 : i32, i32, i32
  }
}

module attributes {stable_mosaic.version = 11 : i64} {
  func.func @_silu_kernel(%arg0: i32, %arg1: i32, %arg2: memref<1x4x256xf32, #tpu.memory_space<vmem>>, %arg3: memref<1x4x256xf32, #tpu.memory_space<vmem>>) attributes {dimension_semantics = [#tpu.dimension_semantics<parallel>, #tpu.dimension_semantics<parallel>], iteration_bounds = array<i64: 2, 1>, scalar_prefetch = 0 : i64, scratch_operands = 0 : i64, tpu.core_type = #tpu.core_type<tc>, window_params = [{transform_indices = @transform_0, window_bounds = array<i64: 1, 4, 256>}, {transform_indices = @transform_1, window_bounds = array<i64: 1, 4, 256>}]} {
    %c0 = arith.constant 0 : index
    %c0_0 = arith.constant 0 : index
    %c0_1 = arith.constant 0 : index
    %0 = vector.load %arg2[%c0, %c0_0, %c0_1] : memref<1x4x256xf32, #tpu.memory_space<vmem>>, vector<1x4x256xf32>
    %1 = arith.negf %0 : vector<1x4x256xf32>
    %2 = math.exp %1 : vector<1x4x256xf32>
    %cst = arith.constant 1.000000e+00 : f32
    %3 = vector.broadcast %cst : f32 to vector<1x4x256xf32>
    %4 = arith.addf %3, %2 : vector<1x4x256xf32>
    %5 = arith.divf %3, %4 : vector<1x4x256xf32>
    %6 = arith.mulf %0, %5 : vector<1x4x256xf32>
    %c0_2 = arith.constant 0 : index
    %c0_3 = arith.constant 0 : index
    %c0_4 = arith.constant 0 : index
    %7 = vector.load %arg3[%c0_2, %c0_3, %c0_4] : memref<1x4x256xf32, #tpu.memory_space<vmem>>, vector<1x4x256xf32>
    tpu.vector_store %arg3[%c0_2, %c0_3, %c0_4], %6 {strides = array<i32>} : memref<1x4x256xf32, #tpu.memory_space<vmem>>, vector<1x4x256xf32>,
    return
  }
  func.func @transform_0(%arg0: i32, %arg1: i32) -> (i32, i32, i32) {
    %c0_i32 = arith.constant 0 : i32
    %c0_i32_0 = arith.constant 0 : i32
    return %arg0, %c0_i32, %arg1 : i32, i32, i32
  }
  func.func @transform_1(%arg0: i32, %arg1: i32) -> (i32, i32, i32) {
    %c0_i32 = arith.constant 0 : i32
    %c0_i32_0 = arith.constant 0 : i32
    return %arg0, %c0_i32, %arg1 : i32, i32, i32
  }
}

</mosaic_0001>

<bundles_post_ra>
// kernel: feed_forward.3
= control target key start
LH: loop header
LB: loop body
LE: loop exit
PB: predicated region body
PF: predicated region fallthrough
CT: control target
= control target key end

     0   :  { %s348_s6 = smov 0   ;;  %s350_s7 = smov 0   ;;  %s384_s0 = inlined_call_operand.vmem [shape: f32[2,4,256], index: 0, kind: input, shape index: {}]   ;;  %s385_s1 = inlined_call_operand.vmem [shape: f32[2,4,256], index: 1, kind: output, shape index: {}]  }
   0x1   :  { %s352_s8 = smov 0  }
   0x2 LB: > { %s23_s9 = sadd.s32 1, %s332_s7  ;;  %p277_p0 = scmp.ge.s32.totalorder %s336_s8, 1  ;;  %s336_s8 = sphi %s352_s8, %s11_s8   ;;  %s332_s7 = sphi %s350_s7, %s387_s7   ;;  %s328_s6 = sphi %s348_s6, %s386_s6  }
   0x3   : > { %p25_p1 = scmp.ge.s32.totalorder %s23_s9, 2  ;;  %p108_p2 = scmp.lt.s32.totalorder %s336_s8, 3 }
   0x5   : > { %s389_s9 = smov (%p25_p1, %s23_s9), 0  ;;  %p109_p3 = pnand %p277_p0, %p108_p2 }
   0x6   : > { %p137_p4 = scmp.lt.s32.totalorder (!%p109_p3), %s328_s6, 1  ;;  %vm161_vm0 = vcmask (!%p109_p3), 1043456  }
   0x7   : > { %112 = sbr.rel (%p109_p3) target bundleno = 53 (0x35), region = 24 }
   0xe   : > { %s391_s6 = smov (!%p137_p4, %s328_s6), 1 }
   0xf   : > { %s284_s10 = sshll.u32 %s391_s6, 3 }
  0x10   : > { %s144_s13 = scalar_lea.vmem %s384_s0, %s284_s10  ;;  %s154_s16 = scalar_lea.vmem %s385_s1, %s284_s10 }
  0x11   : > { %v156_v0 = vld [vmem:[%s144_s13] sm:$0xff] }
  0x12   : > { %v157_v1 = vmul.f32 %v156_v0, %v156_v0 }
  0x14   : > { %v159_v2 = vcombine.high %v157_v1, %v157_v1  ;;  %v162_v3 = vsel %vm161_vm0, %v157_v1, 0.0 }
  0x15   : > { %v163_v4 = vrot.slane %v162_v3, 4 }
  0x16   : > { %v169_v5 = vsel %vm161_vm0, %v159_v2, 0.0 }
  0x17   : > { %v164_v6 = vadd.f32 %v163_v4, %v162_v3  ;;  %v170_v7 = vrot.slane %v169_v5, 4 }
  0x19   : > { %v165_v8 = vrot.slane %v164_v6, 2  ;;  %v171_v9 = vadd.f32 %v170_v7, %v169_v5 }
  0x1b   : > { %v166_v10 = vadd.f32 %v165_v8, %v164_v6  ;;  %v172_v11 = vrot.slane %v171_v9, 2 }
  0x1d   : > { %v167_v12 = vrot.slane %v166_v10, 1  ;;  %v173_v13 = vadd.f32 %v172_v11, %v171_v9 }
  0x1f   : > { %v168_v14 = vadd.f32 %v167_v12, %v166_v10  ;;  %v174_v15 = vrot.slane %v173_v13, 1 }
  0x21   : > { %v175_v16 = vadd.f32 %v174_v15, %v173_v13  ;;  %310 = vrsqrt.f32 %v168_v14 }
  0x23   : > { %312 = vrsqrt.f32 %v175_v16 }
  0x2b   : > { %v311_v17 = vpop.eup %310 }
  0x2c   : > { %v178_v18 = vmin.f32 %v311_v17, 1e+12 }
  0x2d   : > { %v313_v19 = vpop.eup %312 }
  0x2e   : > { %v179_v20 = vmin.f32 %v313_v19, 1e+12 }
  0x30   : > { %v182_v21 = vcombine.low %v178_v18, %v179_v20 }
  0x32   : > { %v184_v22 = vmul.f32 %v182_v21, %v156_v0 }
  0x34   : > { %185 = vst [vmem:[%s154_s16] sm:$0xff] %v184_v22 }
  0x35 PF: > { %s11_s8 = sadd.s32 1, %s336_s8   ;;  %s386_s6 = smov %s332_s7 }
  0x36   : > { %p8_p5 = scmp.ge.s32.totalorder %s11_s8, 4   ;;  %s387_s7 = smov %s389_s9 }
  0x38   :  { %10 = sbr.rel (!%p8_p5) target bundleno = 2 (0x2), region = 54 }

// kernel: custom-call.1
= control target key start
LH: loop header
LB: loop body
LE: loop exit
PB: predicated region body
PF: predicated region fallthrough
CT: control target
= control target key end

     0   :  { %vm4_vm0 = vcmask 1043456   ;;  %s23_s0 = inlined_call_operand.vmem [shape: c64[4,4], index: 0, kind: input, shape index: {}]   ;;  %s24_s1 = inlined_call_operand.vmem [shape: f32[4,4], index: 1, kind: output, shape index: {}]  }
   0x1   :  { %v6_v0 = vld [vmem:[%s23_s0 + $0x4] sm:$0xf] }
   0x2   :  { %5 = vst.msk [vmem:[%s24_s1] sm:$0xff] %vm4_vm0, %v6_v0 }

// kernel: custom-call
= control target key start
LH: loop header
LB: loop body
LE: loop exit
PB: predicated region body
PF: predicated region fallthrough
CT: control target
= control target key end

     0   :  { %vm3_vm0 = vcmask 1043456   ;;  %s21_s0 = inlined_call_operand.vmem [shape: c64[4,4], index: 0, kind: input, shape index: {}]   ;;  %s22_s1 = inlined_call_operand.vmem [shape: f32[4,4], index: 1, kind: output, shape index: {}]  }
   0x1   :  { %v2_v0 = vld [vmem:[%s21_s0] sm:$0xf] }
   0x2   :  { %4 = vst.msk [vmem:[%s22_s1] sm:$0xff] %vm3_vm0, %v2_v0 }

// kernel: feed_forward.4
= control target key start
LH: loop header
LB: loop body
LE: loop exit
PB: predicated region body
PF: predicated region fallthrough
CT: control target
= control target key end

     0   :  { %s429_s9 = smov 0   ;;  %s431_s10 = smov 0   ;;  %s462_s0 = inlined_call_operand.vmem [shape: f32[2,8,256], index: 0, kind: input, shape index: {}]   ;;  %s463_s1 = inlined_call_operand.vmem [shape: f32[8,8], index: 1, kind: input, shape index: {}]   ;;  %s464_s2 = inlined_call_operand.vmem [shape: f32[2,8,256], index: 2, kind: output, shape index: {}]  }
   0x1   :  { %s433_s11 = smov 0  }
   0x2 LB: > { %s24_s12 = sadd.s32 1, %s407_s10  ;;  %p354_p0 = scmp.ge.s32.totalorder %s411_s11, 1  ;;  %s411_s11 = sphi %s433_s11, %s12_s11   ;;  %s407_s10 = sphi %s431_s10, %s466_s10   ;;  %s403_s9 = sphi %s429_s9, %s465_s9  }
   0x3   : > { %p26_p1 = scmp.ge.s32.totalorder %s24_s12, 2  ;;  %p133_p2 = scmp.lt.s32.totalorder %s411_s11, 3 }
   0x5   : > { %s468_s12 = smov (%p26_p1, %s24_s12), 0  ;;  %p134_p3 = pnand %p354_p0, %p133_p2 }
   0x6   : > { %p164_p4 = scmp.lt.s32.totalorder (!%p134_p3), %s403_s9, 1  ;;  %v413_v0 = vmov (!%p134_p3), 0.0   ;;  %v183_v3 = vld [vmem:[%s463_s1] sm:$0xff] (!%p134_p3)  ;;  %vm186_vm0 = vcmask (!%p134_p3), 64512  }
   0x7   : > { %137 = sbr.rel (%p134_p3) target bundleno = 234 (0xea), region = 28  ;;  %254 = vmatprep.mubr.f32.mxu0 (!%p134_p3), %v413_v0 }
   0xe   : > { %s470_s9 = smov (!%p164_p4, %s403_s9), 1 }
   0xf   : > { %s362_s13 = sshll.u32 %s470_s9, 4 }
  0x10   : > { %s171_s16 = scalar_lea.vmem %s462_s0, %s362_s13  ;;  %s181_s21 = scalar_lea.vmem %s464_s2, %s362_s13 }
  0x11   : > { %v185_v1 = vld [vmem:[%s171_s16 + $0x8] sm:$0xff]  ;;  %v184_v2 = vld [vmem:[%s171_s16] sm:$0xff] }
  0x12   : > { %190 = vmatprep.subr.mxu0 %v185_v1 }
  0x13   : > { %191 = vmatpush1.msra.mxu0 %v184_v2 }
  0x14   : > { %359 = vmatmul.mubr.msk.f32.vlgmr.msra.gmra.mrb[0].mxu0 %vm186_vm0, %v183_v3 }
  0xe7   : > { %v256_v4 = vpop.f32.mrb[0].mxu0 }
  0xe8   : > { %261 = vst [vmem:[%s181_s21] sm:$0xff] %v256_v4  ;;  %v258_v5 = vpop.f32.mrb[1].mxu0 }
  0xe9   : > { %262 = vst [vmem:[%s181_s21 + $0x8] sm:$0xff] %v258_v5 }
  0xea PF: > { %s12_s11 = sadd.s32 1, %s411_s11   ;;  %s465_s9 = smov %s407_s10 }
  0xeb   : > { %p9_p5 = scmp.ge.s32.totalorder %s12_s11, 4   ;;  %s466_s10 = smov %s468_s12 }
  0xed   :  { %11 = sbr.rel (!%p9_p5) target bundleno = 2 (0x2), region = 58 }

// kernel: reverse.0
= control target key start
LH: loop header
LB: loop body
LE: loop exit
PB: predicated region body
PF: predicated region fallthrough
CT: control target
= control target key end

     0   :  { %v71_v3 = vlaneseq  ;;  %v64_v9 = vld [vmem:[#allocation0 + $0x7] ss:$-1 sm:$0xff]  ;;  %v78_v12 = vld [vmem:[#allocation0 + $0x17] ss:$-1 sm:$0xff]  ;;  %s329_s0 = inlined_call_operand.vmem [shape: f32[2,4,16,7], index: 0, kind: input, shape index: {}]   ;;  %s330_s1 = inlined_call_operand.vmem [shape: f32[2,4,16,7], index: 1, kind: output, shape index: {}]  }
   0x1   :  { %v44_v0 = vld [vmem:[%s329_s0] sm:$0xff]  ;;  %v46_v1 = vld [vmem:[%s329_s0 + $0x8] sm:$0xff]  ;;  %v48_v2 = vld [vmem:[%s329_s0 + $0x10] sm:$0xff]  ;;  %v65_v10 = vrot.slane %v64_v9, 1  ;;  %v79_v14 = vrot.slane %v78_v12, 1 }
   0x2   :  { %45 = vst [vmem:[#allocation0 + $0x8] sm:$0xff] %v44_v0  ;;  %47 = vst [vmem:[#allocation0 + $0x18] sm:$0xff] %v46_v1  ;;  %v50_v4 = vld [vmem:[%s329_s0 + $0x18] sm:$0xff]  ;;  %v52_v5 = vld [vmem:[%s329_s0 + $0x20] sm:$0xff]  ;;  %v72_v11 = vshrl.u32 %v71_v3, 7 }
   0x3   :  { %49 = vst [vmem:[#allocation0 + $0x28] sm:$0xff] %v48_v2  ;;  %v54_v6 = vld [vmem:[%s329_s0 + $0x28] sm:$0xff]  ;;  %51 = vst [vmem:[#allocation0 + $0x38] sm:$0xff] %v50_v4  ;;  %v56_v7 = vld [vmem:[%s329_s0 + $0x30] sm:$0xff] }
   0x4   :  { %53 = vst [vmem:[#allocation0 + $0x48] sm:$0xff] %v52_v5  ;;  %55 = vst [vmem:[#allocation0 + $0x58] sm:$0xff] %v54_v6  ;;  %v58_v8 = vld [vmem:[%s329_s0 + $0x38] sm:$0xff]  ;;  %v92_v13 = vld [vmem:[#allocation0 + $0x27] ss:$-1 sm:$0xff]  ;;  %vm73_vm0 = vcmp.lt.s32.totalorder %v72_v11, 7 }
   0x5   :  { %57 = vst [vmem:[#allocation0 + $0x68] sm:$0xff] %v56_v7  ;;  %59 = vst [vmem:[#allocation0 + $0x78] sm:$0xff] %v58_v8  ;;  %v93_v15 = vrot.slane %v92_v13, 1  ;;  %v106_v16 = vld [vmem:[#allocation0 + $0x37] ss:$-1 sm:$0xff] }
   0x6   :  { %66 = vst [vmem:[#allocation1] sm:$0xff] %v65_v10  ;;  %v107_v17 = vrot.slane %v106_v16, 1  ;;  %v120_v18 = vld [vmem:[#allocation0 + $0x47] ss:$-1 sm:$0xff]  ;;  %v134_v19 = vld [vmem:[#allocation0 + $0x57] ss:$-1 sm:$0xff] }
   0x7   :  { %80 = vst [vmem:[#allocation1 + $0x8] sm:$0xff] %v79_v14  ;;  %94 = vst [vmem:[#allocation1 + $0x10] sm:$0xff] %v93_v15  ;;  %v121_v20 = vrot.slane %v120_v18, 1  ;;  %v135_v21 = vrot.slane %v134_v19, 1  ;;  %v148_v22 = vld [vmem:[#allocation0 + $0x67] ss:$-1 sm:$0xff] }
   0x8   :  { %v162_v23 = vld [vmem:[#allocation0 + $0x77] ss:$-1 sm:$0xff]  ;;  %108 = vst [vmem:[#allocation1 + $0x18] sm:$0xff] %v107_v17  ;;  %v149_v24 = vrot.slane %v148_v22, 1 }
   0x9   :  { %v163_v25 = vrot.slane %v162_v23, 1  ;;  %v69_v26 = vld [vmem:[#allocation0 + $0xf] ss:$-1 sm:$0xff]  ;;  %v83_v27 = vld [vmem:[#allocation0 + $0x1f] ss:$-1 sm:$0xff]  ;;  %122 = vst [vmem:[#allocation1 + $0x20] sm:$0xff] %v121_v20 }
   0xa   :  { %v97_v28 = vld [vmem:[#allocation0 + $0x2f] ss:$-1 sm:$0xff]  ;;  %136 = vst [vmem:[#allocation1 + $0x28] sm:$0xff] %v135_v21  ;;  %v70_v29 = vrot.slane %v69_v26, 1  ;;  %v84_v30 = vrot.slane %v83_v27, 1  ;;  %150 = vst [vmem:[#allocation1 + $0x30] sm:$0xff] %v149_v24 }
   0xb   :  { %v98_v31 = vrot.slane %v97_v28, 1  ;;  %v111_v32 = vld [vmem:[#allocation0 + $0x3f] ss:$-1 sm:$0xff]  ;;  %164 = vst [vmem:[#allocation1 + $0x38] sm:$0xff] %v163_v25  ;;  %v125_v34 = vld [vmem:[#allocation0 + $0x4f] ss:$-1 sm:$0xff] }
   0xc   :  { %v112_v33 = vrot.slane %v111_v32, 1  ;;  %v139_v35 = vld [vmem:[#allocation0 + $0x5f] ss:$-1 sm:$0xff]  ;;  %74 = vst.msk [vmem:[#allocation1] sm:$0xff] %vm73_vm0, %v70_v29  ;;  %88 = vst.msk [vmem:[#allocation1 + $0x8] sm:$0xff] %vm73_vm0, %v84_v30  ;;  %v126_v36 = vrot.slane %v125_v34, 1 }
   0xd   :  { %102 = vst.msk [vmem:[#allocation1 + $0x10] sm:$0xff] %vm73_vm0, %v98_v31  ;;  %v140_v37 = vrot.slane %v139_v35, 1  ;;  %v153_v38 = vld [vmem:[#allocation0 + $0x6f] ss:$-1 sm:$0xff]  ;;  %v167_v39 = vld [vmem:[#allocation0 + $0x7f] ss:$-1 sm:$0xff] }
   0xe   :  { %116 = vst.msk [vmem:[#allocation1 + $0x18] sm:$0xff] %vm73_vm0, %v112_v33  ;;  %v154_v40 = vrot.slane %v153_v38, 1  ;;  %v168_v41 = vrot.slane %v167_v39, 1  ;;  %130 = vst.msk [vmem:[#allocation1 + $0x20] sm:$0xff] %vm73_vm0, %v126_v36 }
   0xf   :  { %144 = vst.msk [vmem:[#allocation1 + $0x28] sm:$0xff] %vm73_vm0, %v140_v37 }
  0x10   :  { %158 = vst.msk [vmem:[#allocation1 + $0x30] sm:$0xff] %vm73_vm0, %v154_v40  ;;  %172 = vst.msk [vmem:[#allocation1 + $0x38] sm:$0xff] %vm73_vm0, %v168_v41 }
  0x13   :  { %v214_v42 = vld [vmem:[#allocation1] sm:$0xff]  ;;  %v216_v43 = vld [vmem:[#allocation1 + $0x8] sm:$0xff] }
  0x14   :  { %v218_v44 = vld [vmem:[#allocation1 + $0x10] sm:$0xff]  ;;  %215 = vst [vmem:[%s330_s1] sm:$0xff] %v214_v42  ;;  %217 = vst [vmem:[%s330_s1 + $0x8] sm:$0xff] %v216_v43 }
  0x15   :  { %219 = vst [vmem:[%s330_s1 + $0x10] sm:$0xff] %v218_v44  ;;  %v220_v45 = vld [vmem:[#allocation1 + $0x18] sm:$0xff]  ;;  %v222_v46 = vld [vmem:[#allocation1 + $0x20] sm:$0xff] }
  0x16   :  { %221 = vst [vmem:[%s330_s1 + $0x18] sm:$0xff] %v220_v45  ;;  %v224_v47 = vld [vmem:[#allocation1 + $0x28] sm:$0xff]  ;;  %223 = vst [vmem:[%s330_s1 + $0x20] sm:$0xff] %v222_v46 }
  0x17   :  { %225 = vst [vmem:[%s330_s1 + $0x28] sm:$0xff] %v224_v47  ;;  %v226_v48 = vld [vmem:[#allocation1 + $0x30] sm:$0xff]  ;;  %v228_v49 = vld [vmem:[#allocation1 + $0x38] sm:$0xff] }
  0x18   :  { %227 = vst [vmem:[%s330_s1 + $0x30] sm:$0xff] %v226_v48  ;;  %229 = vst [vmem:[%s330_s1 + $0x38] sm:$0xff] %v228_v49 }

// kernel: feed_forward.5
= control target key start
LH: loop header
LB: loop body
LE: loop exit
PB: predicated region body
PF: predicated region fallthrough
CT: control target
= control target key end

     0   :  { %s328_s6 = smov 0   ;;  %s330_s7 = smov 0   ;;  %s349_s0 = inlined_call_operand.vmem [shape: f32[2,4,256], index: 0, kind: input, shape index: {}]   ;;  %s350_s1 = inlined_call_operand.vmem [shape: f32[2,4,256], index: 1, kind: output, shape index: {}]  }
   0x1   :  { %s332_s8 = smov 0  }
   0x2 LB: > { %s23_s9 = sadd.s32 1, %s312_s7  ;;  %p256_p0 = scmp.ge.s32.totalorder %s316_s8, 1  ;;  %s316_s8 = sphi %s332_s8, %s11_s8   ;;  %s312_s7 = sphi %s330_s7, %s352_s7   ;;  %s308_s6 = sphi %s328_s6, %s351_s6  }
   0x3   : > { %p25_p1 = scmp.ge.s32.totalorder %s23_s9, 2  ;;  %p108_p2 = scmp.lt.s32.totalorder %s316_s8, 3 }
   0x5   : > { %s354_s9 = smov (%p25_p1, %s23_s9), 0  ;;  %p109_p3 = pnand %p256_p0, %p108_p2 }
   0x6   : > { %p137_p4 = scmp.lt.s32.totalorder (!%p109_p3), %s308_s6, 1 }
   0x7   : > { %112 = sbr.rel (%p109_p3) target bundleno = 47 (0x2f), region = 24 }
   0xe   : > { %s356_s6 = smov (!%p137_p4, %s308_s6), 1 }
   0xf   : > { %s264_s10 = sshll.u32 %s356_s6, 3 }
  0x10   : > { %s144_s13 = scalar_lea.vmem %s349_s0, %s264_s10  ;;  %s154_s16 = scalar_lea.vmem %s350_s1, %s264_s10 }
  0x11   : > { %v156_v0 = vld [vmem:[%s144_s13] sm:$0xff] }
  0x12   : > { %v261_v1 = vmul.f32 -1.442695, %v156_v0 }
  0x14   : > { %290 = vpow2.f32 %v261_v1 }
  0x1e   : > { %v291_v2 = vpop.eup %290 }
  0x1f   : > { %v160_v3 = vadd.f32 1.0, %v291_v2 }
  0x21   : > { %292 = vrcp.f32 %v160_v3 }
  0x2b   : > { %v293_v4 = vpop.eup %292 }
  0x2c   : > { %v163_v5 = vmul.f32 %v293_v4, %v156_v0 }
  0x2e   : > { %164 = vst [vmem:[%s154_s16] sm:$0xff] %v163_v5 }
  0x2f PF: > { %s11_s8 = sadd.s32 1, %s316_s8   ;;  %s351_s6 = smov %s312_s7 }
  0x30   : > { %p8_p5 = scmp.ge.s32.totalorder %s11_s8, 4   ;;  %s352_s7 = smov %s354_s9 }
  0x32   :  { %10 = sbr.rel (!%p8_p5) target bundleno = 2 (0x2), region = 54 }

</bundles_post_ra>
